<compile_context>
chip_gen: v6e
topology: v6e:2x2x1
jax: 0.10.0
libtpu: 0.0.40
codegen_flags: <defaults>
</compile_context>

<pallas_src>
import functools

import jax
import jax.numpy as jnp
from jax.experimental import pallas as pl
from jax.experimental.pallas import tpu as pltpu


# ----------------------------------------------------------------------------
# Kernels
# ----------------------------------------------------------------------------
def _fused_kernel(x_ref, w1t_ref, w2_ref, o_ref, *, inv_hw):
    """Whole (C, HW) map per batch image resident in VMEM: pool + MLP + gate."""
    x = x_ref[0]                                                  # (C, HW) input dtype
    s = jnp.sum(x, axis=1, keepdims=True, dtype=jnp.float32)      # (C, 1) f32 accum
    m = jnp.max(x, axis=1, keepdims=True).astype(jnp.float32)     # (C, 1)
    pool = (0.5 * inv_hw) * s + 0.5 * m                           # (C, 1)

    # Tiny bias-free MLP on the pooled vector, done with VPU broadcast-mul +
    # reductions (hidden dim is tiny; avoids an N=1 MXU GEMV and transposes).
    h = jnp.maximum(jnp.sum(w1t_ref[...] * pool, axis=0, keepdims=True), 0.0)  # (1, hid_p)
    attn = jnp.sum(w2_ref[...] * h, axis=1, keepdims=True)                     # (C, 1)
    gate = jax.nn.sigmoid(attn)                                                # (C, 1) f32

    # Gating multiply in the input dtype (no resident full-map f32 temp).
    o_ref[0] = (x_ref[0] * gate.astype(o_ref.dtype)).astype(o_ref.dtype)


def _pool_kernel(x_ref, sum_ref, max_ref, *, hw, tile, has_tail):
    """Tiled pooling pass: accumulate running sum/max over spatial tiles
    directly into the (1, cb, 1) output blocks (revisited across the last,
    'arbitrary' grid axis). Tail lanes of a cdiv grid are masked."""
    t = pl.program_id(2)

    @pl.when(t == 0)
    def _():
        sum_ref[...] = jnp.zeros(sum_ref.shape, jnp.float32)
        max_ref[...] = jnp.full(max_ref.shape, -jnp.inf, jnp.float32)

    x = x_ref[0].astype(jnp.float32)                              # (cb, T)
    if has_tail:
        lane = t * tile + jax.lax.broadcasted_iota(jnp.int32, (1, tile), 1)
        valid = lane < hw                                         # (1, T)
        xs = jnp.where(valid, x, 0.0)
        xm = jnp.where(valid, x, -jnp.inf)
    else:
        xs, xm = x, x
    sum_ref[0] = sum_ref[0] + jnp.sum(xs, axis=1, keepdims=True)
    max_ref[0] = jnp.maximum(max_ref[0], jnp.max(xm, axis=1, keepdims=True))


def _apply_kernel(gate_ref, x_ref, o_ref):
    """Tiled gating pass: out = x * gate, lane-dense (C, T) blocks."""
    gate = gate_ref[0]                                            # (C, 1) f32
    o_ref[0] = (x_ref[0].astype(jnp.float32) * gate).astype(o_ref.dtype)


# ----------------------------------------------------------------------------
# Budget / tiling helpers
# ----------------------------------------------------------------------------
def _budgets():
    """Per-generation VMEM / tiling budgets (v7x has half the VMEM of v5e/v6e)."""
    vmem_phys = 128 << 20
    try:
        info = pltpu.get_tpu_info()
        vmem_phys = int(getattr(info, "vmem_capacity_bytes", vmem_phys)) or vmem_phys
    except Exception:
        pass
    if vmem_phys <= (64 << 20):
        # v7x-class: 64 MiB physical VMEM, ~3.2 TB/s HBM -> bigger tiles,
        # but a tighter scoped limit and a smaller fused per-image cap.
        return dict(vmem_limit=48 << 20, fused_cap=5 << 20, tile_target=6 << 20)
    # v5e / v6e: 128 MiB physical VMEM.
    return dict(vmem_limit=80 << 20, fused_cap=10 << 20, tile_target=4 << 20)


def _pick_spatial_tile(hw, c, itemsize, tile_target, vmem_limit):
    """Multiple-of-128 spatial tile targeting ~tile_target bytes per (C, T)
    block while keeping double-buffered in+out (+f32 temps) inside VMEM."""
    tile_bytes = min(tile_target, vmem_limit // 8)
    t = (tile_bytes // max(1, c * itemsize)) // 128 * 128
    if t < 128:
        t = 128
    if t >= hw:
        return hw
    return int(t)


def _pick_channel_block(c, b):
    """Per-channel pooling is independent; split channels so a v7x megacore
    (2 TensorCores) stays busy at batch 1. Harmless on single-TC v5e/v6e."""
    if b >= 2 or c % 16 != 0:
        return c
    return c // 2


# ----------------------------------------------------------------------------
# Wrapper
# ----------------------------------------------------------------------------
def light_channel_attention(x_nchw, w1, w2, *, force_tiled=False, spatial_tile=None):
    """LightChannelAttention forward.

    x_nchw : (B, C, H, W)  activations (f32 or bf16)
    w1     : (hidden, C)   first 1x1 conv weight (squeezed from (hidden, C, 1, 1))
    w2     : (C, hidden)   second 1x1 conv weight (squeezed from (C, hidden, 1, 1))
    """
    B, C, H, W = x_nchw.shape
    HW = H * W
    x = x_nchw.reshape(B, C, HW)                 # zero-copy view of NCHW
    itemsize = x.dtype.itemsize
    inv_hw = 1.0 / float(HW)

    budgets = _budgets()
    vmem_limit = budgets["vmem_limit"]
    common = dict(vmem_limit_bytes=vmem_limit)

    hid = w1.shape[0]
    w1f = w1.astype(jnp.float32)
    w2f = w2.astype(jnp.float32)

    # Fused cutover derived from actual VMEM need: 2x(in)+2x(out) double
    # buffers plus a transient f32 working set  ->  ~8x block bytes.
    block_bytes = C * HW * itemsize
    fused_cap = min(budgets["fused_cap"], vmem_limit // 8)
    use_fused = (not force_tiled) and (block_bytes <= fused_cap)

    if use_fused:
        # --- fused path: whole (C, HW) map per image, 1 HBM read + 1 write ---
        # Zero-pad the tiny hidden dim to a sublane multiple of 8 (inert:
        # padded w1 columns give relu(0)=0, padded w2 columns are zero).
        hid_p = max(8, ((hid + 7) // 8) * 8)
        w1t_p = jnp.zeros((C, hid_p), jnp.float32).at[:, :hid].set(w1f.T)
        w2_p = jnp.zeros((C, hid_p), jnp.float32).at[:, :hid].set(w2f)
        w_bytes = 2 * C * hid_p * 4

        # TODO(synk): at B=1 on v7x only one TensorCore is used here; a
        # channel-split fused variant would need a cross-block pool exchange.
        out = pl.pallas_call(
            functools.partial(_fused_kernel, inv_hw=inv_hw),
            out_shape=jax.ShapeDtypeStruct((B, C, HW), x.dtype),
            grid_spec=pltpu.PrefetchScalarGridSpec(
                num_scalar_prefetch=0,
                grid=(B,),
                in_specs=[
                    pl.BlockSpec((1, C, HW), lambda b: (b, 0, 0)),
                    pl.BlockSpec((C, hid_p), lambda b: (0, 0)),
                    pl.BlockSpec((C, hid_p), lambda b: (0, 0)),
                ],
                out_specs=pl.BlockSpec((1, C, HW), lambda b: (b, 0, 0)),
            ),
            compiler_params=pltpu.CompilerParams(
                dimension_semantics=("parallel",), **common),
            cost_estimate=pl.CostEstimate(
                flops=3 * B * C * HW + 4 * B * C * hid_p,
                transcendentals=B * C,
                bytes_accessed=2 * B * C * HW * itemsize + w_bytes),
        )(x, w1t_p, w2_p)
        return out.reshape(B, C, H, W)

    # --- tiled path: pooling pass + tiny JAX MLP + gating pass ---------------
    if spatial_tile is not None:
        T = int(spatial_tile)
        if T >= HW:
            T = HW
        elif T % 128 != 0:
            T = max(128, (T // 128) * 128)
    else:
        T = _pick_spatial_tile(HW, C, itemsize, budgets["tile_target"], vmem_limit)
    n_t = pl.cdiv(HW, T)
    has_tail = (HW % T) != 0

    cb = _pick_channel_block(C, B)
    n_cb = C // cb

    sums, maxs = pl.pallas_call(
        functools.partial(_pool_kernel, hw=HW, tile=T, has_tail=has_tail),
        out_shape=(jax.ShapeDtypeStruct((B, C, 1), jnp.float32),
                   jax.ShapeDtypeStruct((B, C, 1), jnp.float32)),
        grid_spec=pltpu.PrefetchScalarGridSpec(
            num_scalar_prefetch=0,
            grid=(B, n_cb, n_t),
            in_specs=[pl.BlockSpec((1, cb, T), lambda b, c, t: (b, c, t))],
            out_specs=[pl.BlockSpec((1, cb, 1), lambda b, c, t: (b, c, 0)),
                       pl.BlockSpec((1, cb, 1), lambda b, c, t: (b, c, 0))],
        ),
        compiler_params=pltpu.CompilerParams(
            dimension_semantics=("parallel", "parallel", "arbitrary"), **common),
        cost_estimate=pl.CostEstimate(
            flops=2 * B * C * HW,
            transcendentals=0,
            bytes_accessed=B * C * HW * itemsize + 2 * B * C * 4),
    )(x)

    # Tiny batched MLP + sigmoid outside the kernel (removes weight buffers and
    # the serialized per-image GEMV from the pool pipeline).
    pool = (0.5 * inv_hw) * sums[..., 0] + 0.5 * maxs[..., 0]     # (B, C) f32
    h = jnp.maximum(pool @ w1f.T, 0.0)                            # (B, hid)
    gate = jax.nn.sigmoid(h @ w2f.T)[..., None]                   # (B, C, 1) f32

    out = pl.pallas_call(
        _apply_kernel,
        out_shape=jax.ShapeDtypeStruct((B, C, HW), x.dtype),
        grid_spec=pltpu.PrefetchScalarGridSpec(
            num_scalar_prefetch=0,
            grid=(B, n_t),
            in_specs=[
                pl.BlockSpec((1, C, 1), lambda b, t: (b, 0, 0)),
                pl.BlockSpec((1, C, T), lambda b, t: (b, 0, t)),
            ],
            out_specs=pl.BlockSpec((1, C, T), lambda b, t: (b, 0, t)),
        ),
        compiler_params=pltpu.CompilerParams(
            dimension_semantics=("parallel", "parallel"), **common),
        cost_estimate=pl.CostEstimate(
            flops=B * C * HW,
            transcendentals=0,
            bytes_accessed=2 * B * C * HW * itemsize + B * C * 4),
    )(gate, x)
    return out.reshape(B, C, H, W)


# ----------------------------------------------------------------------------
# Pure-JAX reference (mirrors the PyTorch forward, NCHW)
# ----------------------------------------------------------------------------
def _reference(x, w1, w2):
    pool = 0.5 * jnp.mean(x, axis=(2, 3), keepdims=True) + \
           0.5 * jnp.max(x, axis=(2, 3), keepdims=True)           # (B, C, 1, 1)
    p = pool[..., 0, 0]                                           # (B, C)
    h = jnp.maximum(p @ w1.T, 0.0)                                # (B, hidden)
    attn = h @ w2.T                                               # (B, C)
    gate = jax.nn.sigmoid(attn)[:, :, None, None]
    return x * gate


if __name__ == "__main__":
    B, C, H, W = 2, 32, 16, 16
    reduction = 16
    hidden = C // reduction            # = 2

    key = jax.random.PRNGKey(0)
    kx, k1, k2, kx2 = jax.random.split(key, 4)
    x = jax.random.normal(kx, (B, C, H, W), dtype=jnp.float32)
    # Deterministic synthetic weights for the two bias-free 1x1 convs.
    w1 = jax.random.normal(k1, (hidden, C), dtype=jnp.float32) * 0.1
    w2 = jax.random.normal(k2, (C, hidden), dtype=jnp.float32) * 0.1

    ref = _reference(x, w1, w2)

    # 1) Fused single-pass path (whole (C, HW) map per image in VMEM).
    out = jax.block_until_ready(light_channel_attention(x, w1, w2))
    assert out.shape == (B, C, H, W)
    assert jnp.allclose(out, ref, atol=1e-5, rtol=1e-5), "fused path mismatch"

    # 2) Tiled two-pass path, forced with a 128-lane spatial tile so the
    #    running sum/max accumulation across tiles is exercised.
    out_t = jax.block_until_ready(
        light_channel_attention(x, w1, w2, force_tiled=True, spatial_tile=128))
    assert jnp.allclose(out_t, ref, atol=1e-5, rtol=1e-5), "tiled path mismatch"

    # 3) Tiled path with a non-128-divisible spatial extent (HW = 225):
    #    exercises the cdiv grid + in-kernel tail masking.
    x2 = jax.random.normal(kx2, (B, C, 15, 15), dtype=jnp.float32)
    ref2 = _reference(x2, w1, w2)
    out2 = jax.block_until_ready(
        light_channel_attention(x2, w1, w2, force_tiled=True, spatial_tile=128))
    assert jnp.allclose(out2, ref2, atol=1e-5, rtol=1e-5), "tail-masked tiled path mismatch"

    print("KERNEL_OK")
</pallas_src>

<mosaic_0001>
module attributes {stable_mosaic.version = 11 : i64} {
  func.func @_fused_kernel(%arg0: i32, %arg1: memref<1x32x256xf32, #tpu.memory_space<vmem>>, %arg2: memref<32x8xf32, #tpu.memory_space<vmem>>, %arg3: memref<32x8xf32, #tpu.memory_space<vmem>>, %arg4: memref<1x32x256xf32, #tpu.memory_space<vmem>>) attributes {dimension_semantics = [#tpu.dimension_semantics<parallel>], iteration_bounds = array<i64: 2>, scalar_prefetch = 0 : i64, scratch_operands = 0 : i64, tpu.core_type = #tpu.core_type<tc>, window_params = [{transform_indices = @transform_0, window_bounds = array<i64: 1, 32, 256>}, {pipeline_mode = #tpu.pipeline_mode<synchronous>, transform_indices = @transform_1, window_bounds = array<i64: 32, 8>}, {pipeline_mode = #tpu.pipeline_mode<synchronous>, transform_indices = @transform_2, window_bounds = array<i64: 32, 8>}, {transform_indices = @transform_3, window_bounds = array<i64: 1, 32, 256>}]} {
    %c0 = arith.constant 0 : index
    %c0_0 = arith.constant 0 : index
    %c0_1 = arith.constant 0 : index
    %0 = vector.load %arg1[%c0, %c0_0, %c0_1] : memref<1x32x256xf32, #tpu.memory_space<vmem>>, vector<1x32x256xf32>
    %1 = vector.shape_cast %0 : vector<1x32x256xf32> to vector<32x256xf32>
    %cst = arith.constant dense<0.000000e+00> : vector<32xf32>
    %2 = vector.multi_reduction <add>, %1, %cst [1] : vector<32x256xf32> to vector<32xf32>
    %3 = vector.shape_cast %2 : vector<32xf32> to vector<32x1xf32>
    %cst_2 = arith.constant dense<0xFF800000> : vector<32xf32>
    %4 = vector.multi_reduction <maximumf>, %1, %cst_2 [1] : vector<32x256xf32> to vector<32xf32>
    %5 = vector.shape_cast %4 : vector<32xf32> to vector<32x1xf32>
    %cst_3 = arith.constant 0.001953125 : f32
    %6 = vector.broadcast %cst_3 : f32 to vector<32x1xf32>
    %7 = arith.mulf %6, %3 : vector<32x1xf32>
    %cst_4 = arith.constant 5.000000e-01 : f32
    %8 = vector.broadcast %cst_4 : f32 to vector<32x1xf32>
    %9 = arith.mulf %8, %5 : vector<32x1xf32>
    %10 = arith.addf %7, %9 : vector<32x1xf32>
    %c0_5 = arith.constant 0 : index
    %c0_6 = arith.constant 0 : index
    %11 = vector.load %arg2[%c0_5, %c0_6] : memref<32x8xf32, #tpu.memory_space<vmem>>, vector<32x8xf32>
    %12 = vector.broadcast %10 : vector<32x1xf32> to vector<32x8xf32>
    %13 = arith.mulf %11, %12 : vector<32x8xf32>
    %cst_7 = arith.constant dense<0.000000e+00> : vector<8xf32>
    %14 = vector.multi_reduction <add>, %13, %cst_7 [0] : vector<32x8xf32> to vector<8xf32>
    %15 = vector.shape_cast %14 : vector<8xf32> to vector<1x8xf32>
    %cst_8 = arith.constant 0.000000e+00 : f32
    %16 = vector.broadcast %cst_8 : f32 to vector<1x8xf32>
    %17 = arith.maximumf %15, %16 : vector<1x8xf32>
    %c0_9 = arith.constant 0 : index
    %c0_10 = arith.constant 0 : index
    %18 = vector.load %arg3[%c0_9, %c0_10] : memref<32x8xf32, #tpu.memory_space<vmem>>, vector<32x8xf32>
    %19 = vector.broadcast %17 : vector<1x8xf32> to vector<32x8xf32>
    %20 = arith.mulf %18, %19 : vector<32x8xf32>
    %cst_11 = arith.constant dense<0.000000e+00> : vector<32xf32>
    %21 = vector.multi_reduction <add>, %20, %cst_11 [1] : vector<32x8xf32> to vector<32xf32>
    %22 = vector.shape_cast %21 : vector<32xf32> to vector<32x1xf32>
    %23 = arith.negf %22 : vector<32x1xf32>
    %24 = math.exp %23 : vector<32x1xf32>
    %cst_12 = arith.constant 1.000000e+00 : f32
    %25 = vector.broadcast %cst_12 : f32 to vector<32x1xf32>
    %26 = arith.addf %25, %24 : vector<32x1xf32>
    %27 = arith.divf %25, %26 : vector<32x1xf32>
    %c0_13 = arith.constant 0 : index
    %c0_14 = arith.constant 0 : index
    %c0_15 = arith.constant 0 : index
    %28 = vector.load %arg1[%c0_13, %c0_14, %c0_15] : memref<1x32x256xf32, #tpu.memory_space<vmem>>, vector<1x32x256xf32>
    %29 = vector.shape_cast %28 : vector<1x32x256xf32> to vector<32x256xf32>
    %30 = vector.broadcast %27 : vector<32x1xf32> to vector<32x256xf32>
    %31 = arith.mulf %29, %30 : vector<32x256xf32>
    %c0_16 = arith.constant 0 : index
    %c0_17 = arith.constant 0 : index
    %c0_18 = arith.constant 0 : index
    %32 = vector.load %arg4[%c0_16, %c0_17, %c0_18] : memref<1x32x256xf32, #tpu.memory_space<vmem>>, vector<1x32x256xf32>
    %33 = vector.shape_cast %32 : vector<1x32x256xf32> to vector<32x256xf32>
    %34 = vector.shape_cast %31 : vector<32x256xf32> to vector<1x32x256xf32>
    tpu.vector_store %arg4[%c0_16, %c0_17, %c0_18], %34 {strides = array<i32>} : memref<1x32x256xf32, #tpu.memory_space<vmem>>, vector<1x32x256xf32>,
    return
  }
  func.func @transform_0(%arg0: i32) -> (i32, i32, i32) {
    %c0_i32 = arith.constant 0 : i32
    %c0_i32_0 = arith.constant 0 : i32
    %c0_i32_1 = arith.constant 0 : i32
    return %arg0, %c0_i32, %c0_i32_0 : i32, i32, i32
  }
  func.func @transform_1(%arg0: i32) -> (i32, i32) {
    %c0_i32 = arith.constant 0 : i32
    %c0_i32_0 = arith.constant 0 : i32
    %c0_i32_1 = arith.constant 0 : i32
    return %c0_i32, %c0_i32_0 : i32, i32
  }
  func.func @transform_2(%arg0: i32) -> (i32, i32) {
    %c0_i32 = arith.constant 0 : i32
    %c0_i32_0 = arith.constant 0 : i32
    %c0_i32_1 = arith.constant 0 : i32
    return %c0_i32, %c0_i32_0 : i32, i32
  }
  func.func @transform_3(%arg0: i32) -> (i32, i32, i32) {
    %c0_i32 = arith.constant 0 : i32
    %c0_i32_0 = arith.constant 0 : i32
    %c0_i32_1 = arith.constant 0 : i32
    return %arg0, %c0_i32, %c0_i32_0 : i32, i32, i32
  }
}

</mosaic_0001>

<bundles_post_ra>
// kernel: tpu_custom_call.1
= control target key start
LH: loop header
LB: loop body
LE: loop exit
PB: predicated region body
PF: predicated region fallthrough
CT: control target
= control target key end

     0   :  { %8 = vsyncpa [#allocation3], 0  ;;  %s839_s0 = inlined_call_operand.hbm [shape: f32[2,32,256], index: 0, kind: input, shape index: {}]   ;;  %s840_s1 = inlined_call_operand.vmem [shape: f32[32,8], index: 1, kind: input, shape index: {}]   ;;  %s841_s2 = inlined_call_operand.vmem [shape: f32[32,8], index: 2, kind: input, shape index: {}]   ;;  %s842_s3 = inlined_call_operand.hbm [shape: f32[2,32,256], index: 3, kind: output, shape index: {}]  }
   0x1   :  { %10 = vsyncpa [#allocation3 + $0x1], 0 }
   0x2   :  { %11 = vsyncpa [#allocation4], 0 }
   0x3   :  { %13 = vsyncpa [#allocation4 + $0x1], 0  ;;  %s609_s12 = smov 0   ;;  %s611_s13 = smov 0  }
   0x4   :  { %s613_s14 = smov 0   ;;  %s615_s15 = smov 0  }
   0x5 LB: > { %s630_s16 = sadd.s32 4294967295, %s581_s15   ;;  %s403_s17 = sadd.s32 4294967294, %s581_s15   ;;  %s581_s15 = sphi %s615_s15, %s857_s15   ;;  %s577_s14 = sphi %s613_s14, %s856_s14   ;;  %s573_s13 = sphi %s611_s13, %s855_s13   ;;  %s569_s12 = sphi %s609_s12, %s854_s12  }
   0x6   : > { %s634_s18 = sadd.s32 1, %s581_s15   ;;  %s26_s19 = sadd.s32 1, %s577_s14 }
   0x7   : > { %s23_s20 = ssub.s32 %s581_s15, %s634_s18  ;;  %p33_p0 = scmp.ne.s32.totalorder %s577_s14, %s573_s13 }
   0x8   : > { %p24_p1 = scmp.eq.s32.totalorder %s23_s20, 0  ;;  %p34_p2 = scmp.eq.s32.totalorder %s581_s15, 0 }
   0x9   : > { %p39_p3 = scmp.ne.s32.totalorder %s573_s13, %s569_s12  ;;  %p40_p4 = scmp.eq.s32.totalorder %s630_s16, 0 }
   0xa   : > { %s646_s21 = scalar_select %p24_p1, %s577_s14, %s26_s19  }
   0xb   : > { %p648_p5 = por %p34_p2, %p33_p0  ;;  %p652_p6 = por %p40_p4, %p39_p3 }
   0xc   : > { %p105_p7 = scmp.eq.s32.totalorder %s630_s16, 1  ;;  %p111_p8 = scmp.eq.s32.totalorder %s403_s17, 1 }
   0xd   : > { %s846_s23 = scalar_select %p652_p6, 1, 0 }
   0xe   : > { %p435_p10 = scmp.lt.s32.totalorder %s581_s15, 2  ;;  %p659_p11 = por %p105_p7, %p33_p0 }
   0xf   : > { %p663_p12 = por %p111_p8, %p39_p3  ;;  %s137_s26 = sand.u32 1, %s577_s14  }
  0x10   : > { %s847_s24 = scalar_select %p659_p11, 1, 0 }
  0x11   : > { %s848_s25 = scalar_select %p663_p12, 1, 0 }
  0x12   : > { %s421_s27 = sshll.u32 %s581_s15, 10  ;;  %s406_s28 = sshll.u32 %s137_s26, 6 }
  0x13   : > { %s672_s4 = scalar_lea.hbm %s839_s0, %s421_s27  ;;  %s141_s5 = scalar_lea.vmem [#allocation2], %s406_s28 }
  0x14   : > { %s148_s6 = sshll.u32 %s141_s5, 4  ;;  %p676_p13 = pnand %p435_p10, %p648_p5  ;;  %s680_s6 = int_to_ptr.vmem [resolvable:$true] %s148_s6 }
  0x15   : > { %s682_s8 = scalar_lea.sflag [#allocation3], %s137_s26  ;;  %s489_s9 = scalar_lea.hbm %s672_s4, 1024 }
  0x16   : > { %p490_p0 = scmp.ne.s32.totalorder %s672_s4, %s489_s9  ;;  %p491_p1 = pneg %p676_p13 }
  0x17   : > { %s494_s17 = scalar_lea.hbm %s839_s0, 2048  ;;  %p495_p4 = scmp.lt.s32.totalorder %s672_s4, %s839_s0 }
  0x18   : > { %p492_p2 = pnand %p491_p1, %p490_p0  ;;  %p496_p5 = scmp.lt.s32.totalorder %s494_s17, %s489_s9 }
  0x1a   : > { %p493_p3 = pneg %p492_p2  ;;  %p497_p7 = por %p496_p5, %p495_p4 }
  0x1c   : > { %p498_p8 = pnand %p497_p7, %p493_p3 }
  0x1e   : > { %501 = shalt.err (!%p498_p8)
}
  0x1f   : > { %s502_s22 = scalar_lea.vmem %s680_s6, 1024  ;;  %s583_s26 = smov [#allocation2]  }
  0x20   : > { %p503_p10 = scmp.ne.s32.totalorder %s680_s6, %s502_s22  ;;  %s507_s27 = sshll.u32 %s583_s26, 4  ;;  %s508_s27 = int_to_ptr.vmem [resolvable:$false] %s507_s27 }
  0x21   : > { %s509_s28 = scalar_lea.vmem %s508_s27, 2048  ;;  %p510_p2 = scmp.lt.s32.totalorder %s680_s6, %s508_s27 }
  0x22   : > { %p505_p9 = pnand %p503_p10, %p491_p1  ;;  %p511_p12 = scmp.lt.s32.totalorder %s509_s28, %s502_s22 }
  0x24   : > { %p506_p0 = pneg %p505_p9  ;;  %p512_p11 = por %p511_p12, %p510_p2 }
  0x26   : > { %p513_p6 = pnand %p512_p11, %p506_p0 }
  0x28   : > { %516 = shalt.err (!%p513_p6)
}
  0x29   : > { %s584_s29 = smov 256   ;;  %s585_s30 = smov 16  }
  0x2a   : > { %430 = dma.hbm_to_vmem [thread:$0]  (!%p676_p13), %s672_s4, 1024, %s680_s6, %s682_s8, %s584_s29, %s584_s29, %s585_s30  }
  0x2b   : > { %p409_p9 = scmp.ge.s32.totalorder %s581_s15, 1  ;;  %p156_p1 = scmp.lt.s32.totalorder %s581_s15, 3 }
  0x2d   : > { %p157_p3 = pnand %p409_p9, %p156_p1 }
  0x2e   : > { %s706_s5 = sand.u32 (!%p157_p3), 1, %s573_s13   ;;  %p850_p6 = scmp.ne.s32.totalorder (!%p157_p3), %s846_s23, 0 }
  0x2f   : > { %160 = sbr.rel (%p157_p3) target bundleno = 423 (0x1a7), region = 32  ;;  %s410_s9 = sshll.u32 (!%p157_p3), %s706_s5, 6 }
  0x30   : > { %s163_s10 = scalar_lea.sflag (!%p157_p3), [#allocation3], %s706_s5  ;;  %s166_s11 = scalar_lea.vmem (!%p157_p3), [#allocation2], %s410_s9 }
  0x34   : > { %560 = dma.done.wait (%p850_p6), %s163_s10, 1024  }
  0x35   : > { %562 = vsyncadd (%p850_p6), %s163_s10, 4294966272  ;;  %v716_v0 = vld [vmem:[%s166_s11] sm:$0xff]  ;;  %v718_v1 = vld [vmem:[%s166_s11 + $0x8] sm:$0xff]  ;;  %vm241_vm0 = vcmask 64512   ;;  %s422_s23 = sshll.u32 %s630_s16, 10  ;;  %s188_s4 = scalar_lea.vmem [#allocation5], %s410_s9 }
  0x36   : > { %v720_v2 = vld [vmem:[%s166_s11 + $0x10] sm:$0xff]  ;;  %v209_v3 = vmax.f32 %v716_v0, %v718_v1  ;;  %v197_v4 = vadd.f32 %v718_v1, %v716_v0  ;;  %v726_v5 = vld [vmem:[%s166_s11 + $0x18] sm:$0xff]  ;;  %v732_v8 = vld [vmem:[%s166_s11 + $0x20] sm:$0xff]  ;;  %s330_s6 = sshll.u32 %s188_s4, 4  ;;  %s792_s17 = scalar_lea.hbm %s842_s3, %s422_s23  ;;  %s794_s6 = int_to_ptr.vmem [resolvable:$true] %s330_s6 }
  0x37   : > { %v212_v6 = vmax.f32 %v720_v2, %v726_v5  ;;  %v200_v7 = vadd.f32 %v726_v5, %v720_v2  ;;  %v734_v9 = vld [vmem:[%s166_s11 + $0x28] sm:$0xff]  ;;  %v740_v12 = vld [vmem:[%s166_s11 + $0x30] sm:$0xff]  ;;  %v742_v13 = vld [vmem:[%s166_s11 + $0x38] sm:$0xff]  ;;  %s317_s16 = scalar_lea.sflag [#allocation4], %s706_s5  ;;  %s517_s9 = scalar_lea.vmem %s794_s6, 1024 }
  0x38   : > { %210 = vmax.xlane.f32.xlu1 %v209_v3  ;;  %198 = vadd.xlane.f32.xlu0 %v197_v4  ;;  %v215_v10 = vmax.f32 %v732_v8, %v734_v9  ;;  %v203_v11 = vadd.f32 %v734_v9, %v732_v8  ;;  %v218_v14 = vmax.f32 %v740_v12, %v742_v13  ;;  %v234_v24 = vld [vmem:[%s840_s1 + $0x8] sm:$0xff]  ;;  %v233_v27 = vld [vmem:[%s840_s1] sm:$0xff]  ;;  %v235_v33 = vld [vmem:[%s840_s1 + $0x10] sm:$0xff]  ;;  %p518_p11 = scmp.ne.s32.totalorder %s794_s6, %s517_s9  ;;  %p851_p12 = scmp.ne.s32.totalorder %s847_s24, 0 }
  0x39   : > { %v206_v15 = vadd.f32 %v742_v13, %v740_v12  ;;  %v236_v42 = vld [vmem:[%s840_s1 + $0x18] sm:$0xff]  ;;  %v257_v57 = vld [vmem:[%s841_s2 + $0x8] sm:$0xff]  ;;  %v256_v58 = vld [vmem:[%s841_s2] sm:$0xff]  ;;  %s586_s19 = smov [#allocation5]  }
  0x3a   : > { %v259_v60 = vld [vmem:[%s841_s2 + $0x18] sm:$0xff]  ;;  %v258_v61 = vld [vmem:[%s841_s2 + $0x10] sm:$0xff]  ;;  %p519_p13 = pnand %p518_p11, %p851_p12  ;;  %s521_s20 = sshll.u32 %s586_s19, 4  ;;  %s522_s20 = int_to_ptr.vmem [resolvable:$false] %s521_s20 }
  0x3b   : > { %s523_s22 = scalar_lea.vmem %s522_s20, 2048  ;;  %p524_p5 = scmp.lt.s32.totalorder %s794_s6, %s522_s20 }
  0x3c   : > { %213 = vmax.xlane.f32.xlu1 %v212_v6  ;;  %201 = vadd.xlane.f32.xlu0 %v200_v7  ;;  %p520_p4 = pneg %p519_p13  ;;  %p525_p7 = scmp.lt.s32.totalorder %s523_s22, %s517_s9 }
  0x3e   : > { %p526_p8 = por %p525_p7, %p524_p5 }
  0x40   : > { %216 = vmax.xlane.f32.xlu1 %v215_v10  ;;  %204 = vadd.xlane.f32.xlu0 %v203_v11  ;;  %p527_p10 = pnand %p526_p8, %p520_p4 }
  0x44   : > { %219 = vmax.xlane.f32.xlu1 %v218_v14  ;;  %207 = vadd.xlane.f32.xlu0 %v206_v15 }
  0xc1   : > { %v211_v16 = vpop.xlane.xlu1 %210  ;;  %v199_v17 = vpop.xlane.xlu0 %198 }
  0xc2   : > { %v225_v18 = vmul.f32 0.5, %v211_v16  ;;  %v221_v19 = vmul.f32 0.001953125, %v199_v17 }
  0xc4   : > { %v229_v25 = vadd.f32 %v225_v18, %v221_v19 }
  0xc5   : > { %v214_v20 = vpop.xlane.xlu1 %213  ;;  %v202_v21 = vpop.xlane.xlu0 %201 }
  0xc6   : > { %v226_v22 = vmul.f32 0.5, %v214_v20  ;;  %v222_v23 = vmul.f32 0.001953125, %v202_v21  ;;  %v237_v34 = vmul.f32 %v233_v27, %v229_v25 }
  0xc8   : > { %v230_v26 = vadd.f32 %v226_v22, %v222_v23  ;;  %v242_v43 = vsel %vm241_vm0, %v237_v34, 0.0 }
  0xc9   : > { %v217_v28 = vpop.xlane.xlu1 %216  ;;  %v205_v29 = vpop.xlane.xlu0 %204 }
  0xca   : > { %v238_v30 = vmul.f32 %v234_v24, %v230_v26  ;;  %v227_v31 = vmul.f32 0.5, %v217_v28  ;;  %v223_v32 = vmul.f32 0.001953125, %v205_v29 }
  0xcc   : > { %v231_v35 = vadd.f32 %v227_v31, %v223_v32  ;;  %v243_v38 = vsel %vm241_vm0, %v238_v30, 0.0 }
  0xcd   : > { %v220_v36 = vpop.xlane.xlu1 %219  ;;  %v208_v37 = vpop.xlane.xlu0 %207  ;;  %v244_v46 = vadd.f32 %v243_v38, %v242_v43 }
  0xce   : > { %v239_v39 = vmul.f32 %v235_v33, %v231_v35  ;;  %v228_v40 = vmul.f32 0.5, %v220_v36  ;;  %v224_v41 = vmul.f32 0.001953125, %v208_v37 }
  0xd0   : > { %v245_v44 = vsel %vm241_vm0, %v239_v39, 0.0  ;;  %v232_v45 = vadd.f32 %v228_v40, %v224_v41 }
  0xd1   : > { %v246_v48 = vadd.f32 %v245_v44, %v244_v46 }
  0xd2   : > { %v240_v47 = vmul.f32 %v236_v42, %v232_v45 }
  0xd4   : > { %v247_v49 = vsel %vm241_vm0, %v240_v47, 0.0 }
  0xd5   : > { %v248_v50 = vadd.f32 %v247_v49, %v246_v48 }
  0xd7   : > { %v249_v51 = vrot.slane %v248_v50, 4 }
  0xd9   : > { %v250_v52 = vadd.f32 %v249_v51, %v248_v50 }
  0xdb   : > { %v251_v53 = vrot.slane %v250_v52, 2 }
  0xdd   : > { %v252_v54 = vadd.f32 %v251_v53, %v250_v52 }
  0xdf   : > { %v253_v55 = vrot.slane %v252_v54, 1 }
  0xe1   : > { %v254_v56 = vadd.f32 %v253_v55, %v252_v54 }
  0xe3   : > { %v255_v59 = vmax.f32 %v254_v56, 0.0 }
  0xe5   : > { %v261_v62 = vmul.f32 %v257_v57, %v255_v59  ;;  %v260_v63 = vmul.f32 %v256_v58, %v255_v59  ;;  %v263_v6 = vmul.f32 %v259_v60, %v255_v59  ;;  %v262_v7 = vmul.f32 %v258_v61, %v255_v59 }
  0xe7   : > { %v267_v3 = vsel %vm241_vm0, %v261_v62, 0.0  ;;  %v264_v4 = vsel %vm241_vm0, %v260_v63, 0.0  ;;  %v273_v10 = vsel %vm241_vm0, %v263_v6, 0.0  ;;  %v270_v11 = vsel %vm241_vm0, %v262_v7, 0.0 }
  0xe8   : > { %268 = vadd.xlane.f32.xlu1 %v267_v3  ;;  %265 = vadd.xlane.f32.xlu0 %v264_v4 }
  0xec   : > { %274 = vadd.xlane.f32.xlu1 %v273_v10  ;;  %271 = vadd.xlane.f32.xlu0 %v270_v11 }
 0x171   : > { %v269_v14 = vpop.xlane.xlu1 %268  ;;  %v266_v15 = vpop.xlane.xlu0 %265 }
 0x172   : > { %v413_v16 = vmul.f32 -1.442695, %v269_v14  ;;  %v412_v17 = vmul.f32 -1.442695, %v266_v15 }
 0x174   : > { %473 = vpow2.f32 %v413_v16 }
 0x175   : > { %475 = vpow2.f32 %v412_v17  ;;  %v275_v18 = vpop.xlane.xlu1 %274  ;;  %v272_v19 = vpop.xlane.xlu0 %271 }
 0x176   : > { %v415_v20 = vmul.f32 -1.442695, %v275_v18  ;;  %v414_v21 = vmul.f32 -1.442695, %v272_v19 }
 0x178   : > { %477 = vpow2.f32 %v415_v20 }
 0x179   : > { %479 = vpow2.f32 %v414_v21 }
 0x181   : > { %v474_v22 = vpop.eup %473 }
 0x182   : > { %v476_v23 = vpop.eup %475  ;;  %v289_v24 = vadd.f32 1.0, %v474_v22 }
 0x183   : > { %v288_v25 = vadd.f32 1.0, %v476_v23 }
 0x184   : > { %481 = vrcp.f32 %v289_v24 }
 0x185   : > { %v478_v26 = vpop.eup %477  ;;  %483 = vrcp.f32 %v288_v25 }
 0x186   : > { %v480_v27 = vpop.eup %479  ;;  %v291_v28 = vadd.f32 1.0, %v478_v26 }
 0x187   : > { %v290_v29 = vadd.f32 1.0, %v480_v27 }
 0x188   : > { %485 = vrcp.f32 %v291_v28 }
 0x189   : > { %487 = vrcp.f32 %v290_v29 }
 0x191   : > { %v482_v30 = vpop.eup %481 }
 0x192   : > { %v484_v31 = vpop.eup %483  ;;  %v302_v32 = vmul.f32 %v482_v30, %v720_v2  ;;  %v303_v33 = vmul.f32 %v482_v30, %v726_v5 }
 0x193   : > { %v300_v34 = vmul.f32 %v484_v31, %v716_v0  ;;  %v301_v35 = vmul.f32 %v484_v31, %v718_v1 }
 0x194   : > { %310 = vst [vmem:[%s188_s4 + $0x10] sm:$0xff] %v302_v32  ;;  %311 = vst [vmem:[%s188_s4 + $0x18] sm:$0xff] %v303_v33 }
 0x195   : > { %v486_v36 = vpop.eup %485  ;;  %308 = vst [vmem:[%s188_s4] sm:$0xff] %v300_v34  ;;  %309 = vst [vmem:[%s188_s4 + $0x8] sm:$0xff] %v301_v35 }
 0x196   : > { %v488_v37 = vpop.eup %487  ;;  %v306_v2 = vmul.f32 %v486_v36, %v740_v12  ;;  %v307_v5 = vmul.f32 %v486_v36, %v742_v13 }
 0x197   : > { %v304_v0 = vmul.f32 %v488_v37, %v732_v8  ;;  %v305_v1 = vmul.f32 %v488_v37, %v734_v9 }
 0x198   : > { %314 = vst [vmem:[%s188_s4 + $0x30] sm:$0xff] %v306_v2  ;;  %315 = vst [vmem:[%s188_s4 + $0x38] sm:$0xff] %v307_v5 }
 0x199   : > { %312 = vst [vmem:[%s188_s4 + $0x20] sm:$0xff] %v304_v0  ;;  %313 = vst [vmem:[%s188_s4 + $0x28] sm:$0xff] %v305_v1 }
 0x19a   : > { %530 = shalt.err (!%p527_p10)
}
 0x19b   : > { %s531_s26 = scalar_lea.hbm %s792_s17, 1024  ;;  %s535_s29 = scalar_lea.hbm %s842_s3, 2048 }
 0x19c   : > { %p532_p0 = scmp.ne.s32.totalorder %s792_s17, %s531_s26  ;;  %p536_p1 = scmp.lt.s32.totalorder %s792_s17, %s842_s3 }
 0x19d   : > { %p537_p3 = scmp.lt.s32.totalorder %s535_s29, %s531_s26 }
 0x19e   : > { %p533_p2 = pnand %p532_p0, %p851_p12 }
 0x19f   : > { %p538_p6 = por %p537_p3, %p536_p1 }
 0x1a0   : > { %p534_p9 = pneg %p533_p2 }
 0x1a2   : > { %p539_p11 = pnand %p538_p6, %p534_p9 }
 0x1a4   : > { %542 = shalt.err (!%p539_p11)
}
 0x1a5   : > { %s587_s11 = smov 256   ;;  %s588_s23 = smov 16  }
 0x1a6   : > { %425 = dma.vmem_to_hbm [thread:$0]  (%p851_p12), %s794_s6, 1024, %s792_s17, %s317_s16, %s587_s11, %s587_s11, %s588_s23  }
 0x1a7 PF: > { %s345_s4 = sand.u32 1, %s569_s12   ;;  %p852_p13 = scmp.ne.s32.totalorder %s848_s25, 0 }
 0x1a8   : > { %p853_p4 = scmp.ge.s32.totalorder %s581_s15, 2  ;;  %s346_s7 = scalar_lea.sflag [#allocation4], %s345_s4 }
 0x1aa   : > { %p432_p5 = pnand %p853_p4, %p852_p13 }
 0x1ac   : > { %p433_p7 = pneg %p432_p5 }
 0x1ae   : > { %564 = dma.done.wait (%p433_p7), %s346_s7, 1024  }
 0x1af   : > { %566 = vsyncadd (%p433_p7), %s346_s7, 4294966272  ;;  %p16_p8 = scmp.ge.s32.totalorder %s634_s18, 4   ;;  %s854_s12 = smov %s573_s13 }
 0x1b0   : > { %s855_s13 = smov %s577_s14  ;;  %s856_s14 = smov %s646_s21 }
 0x1b1   : > { %s857_s15 = smov %s634_s18  ;;  %18 = sbr.rel (!%p16_p8) target bundleno = 5 (0x5), region = 77 }
 0x1b6   :  { %351 = vsyncpa [#allocation3], 1 }
 0x1b7   :  { %353 = vsyncpa [#allocation3 + $0x1], 1 }
 0x1b8   :  { %354 = vsyncpa [#allocation4], 1 }
 0x1b9   :  { %356 = vsyncpa [#allocation4 + $0x1], 1 }

</bundles_post_ra>
